<compile_context>
chip_gen: v6e
topology: v6e:2x2x1
jax: 0.10.0
libtpu: 0.0.40
codegen_flags: <defaults>
</compile_context>

<pallas_src>
from functools import partial

import jax
import jax.numpy as jnp
from jax.experimental import pallas as pl
from jax.experimental.pallas import tpu as pltpu

_LANE = 128
_SUBLANE = 8
_MAX_BLOCK_BYTES = 2 * 1024 * 1024  # 2 MiB per buffer (4 buffers << 32 MiB scoped VMEM)


def _copy_kernel(x_ref, o_ref):
    # Identity copy of one lane-dense tile.  With input/output aliased this is
    # the minimal "kernel exists" cost for a pure view.
    o_ref[...] = x_ref[...]


def _pick_layout(total, itemsize):
    """Pick a lane-dense (rows, lanes) view of the flat buffer and a row tile."""
    if total % _LANE != 0:
        return None
    # Lane width: biggest multiple of 128 (up to 1024) that divides total.
    lanes = _LANE
    for cand in (1024, 512, 256, 128):
        if total % cand == 0:
            lanes = cand
            break
    rows = total // lanes
    # Row tile: biggest sublane-aligned divisor of rows under the block budget
    # (or the full row extent if it already fits / no aligned divisor exists).
    max_rows = max(1, _MAX_BLOCK_BYTES // (lanes * itemsize))
    block_rows = rows
    if rows > max_rows:
        for cand in range(max_rows, 0, -1):
            if rows % cand == 0 and cand % _SUBLANE == 0:
                block_rows = cand
                break
    return rows, lanes, block_rows


def _unflatten_impl(x, N, C, H, W):
    total = N * C * H * W
    layout = _pick_layout(total, jnp.dtype(x.dtype).itemsize)
    if layout is None:
        # C*H*W*N not a multiple of 128: correctness-first fallback -- a single
        # full-array block (masked stores, but only hit for tiny/odd shapes).
        rows, lanes, block_rows = 1, total, 1
    else:
        rows, lanes, block_rows = layout

    x2d = x.reshape(rows, lanes)          # metadata-only on a contiguous buffer
    grid = (rows // block_rows,)

    out2d = pl.pallas_call(
        _copy_kernel,
        out_shape=jax.ShapeDtypeStruct((rows, lanes), x2d.dtype),
        grid=grid,
        in_specs=[pl.BlockSpec((block_rows, lanes), lambda i: (i, 0))],
        out_specs=pl.BlockSpec((block_rows, lanes), lambda i: (i, 0)),
        input_output_aliases={0: 0},      # no second HBM buffer for a pure view
        compiler_params=pltpu.CompilerParams(
            dimension_semantics=("parallel",),
            vmem_limit_bytes=32 * 1024 * 1024,
        ),
    )(x2d)

    # Metadata-only reshape to NCHW, exactly like torch's .view().
    return out2d.reshape(N, C, H, W)


@partial(jax.jit, static_argnums=(1, 2, 3, 4))
def unflatten(x, N, C, H, W):
    """Pallas equivalent of Unflatten(N, C, H, W).forward(x)."""
    return _unflatten_impl(x, N, C, H, W)


if __name__ == "__main__":
    # Small shapes consistent with the module: N=2, C=4, H=16, W=16.
    N, C, H, W = 2, 4, 16, 16
    key = jax.random.PRNGKey(0)
    x = jax.random.normal(key, (N, C * H * W), dtype=jnp.float32)

    out = unflatten(x, N, C, H, W)
    out = jax.block_until_ready(out)

    # Correctness check against the pure-JAX reference (== torch .view()).
    ref = x.reshape(N, C, H, W)
    assert out.shape == (N, C, H, W)
    assert out.dtype == x.dtype
    assert jnp.array_equal(out, ref)

    print("KERNEL_OK")
</pallas_src>

<mosaic_0001>
module attributes {stable_mosaic.version = 11 : i64} {
  func.func @_copy_kernel(%arg0: i32, %arg1: memref<2x1024xf32, #tpu.memory_space<vmem>>, %arg2: memref<2x1024xf32, #tpu.memory_space<vmem>>) attributes {dimension_semantics = [#tpu.dimension_semantics<parallel>], iteration_bounds = array<i64: 1>, scalar_prefetch = 0 : i64, scratch_operands = 0 : i64, tpu.core_type = #tpu.core_type<tc>, window_params = [{transform_indices = @transform_0, window_bounds = array<i64: 2, 1024>}, {transform_indices = @transform_1, window_bounds = array<i64: 2, 1024>}]} {
    %c0 = arith.constant 0 : index
    %c0_0 = arith.constant 0 : index
    %0 = vector.load %arg1[%c0, %c0_0] : memref<2x1024xf32, #tpu.memory_space<vmem>>, vector<2x1024xf32>
    %c0_1 = arith.constant 0 : index
    %c0_2 = arith.constant 0 : index
    %1 = vector.load %arg2[%c0_1, %c0_2] : memref<2x1024xf32, #tpu.memory_space<vmem>>, vector<2x1024xf32>
    tpu.vector_store %arg2[%c0_1, %c0_2], %0 {strides = array<i32>} : memref<2x1024xf32, #tpu.memory_space<vmem>>, vector<2x1024xf32>,
    return
  }
  func.func @transform_0(%arg0: i32) -> (i32, i32) {
    %c0_i32 = arith.constant 0 : i32
    %c0_i32_0 = arith.constant 0 : i32
    return %arg0, %c0_i32 : i32, i32
  }
  func.func @transform_1(%arg0: i32) -> (i32, i32) {
    %c0_i32 = arith.constant 0 : i32
    %c0_i32_0 = arith.constant 0 : i32
    return %arg0, %c0_i32 : i32, i32
  }
}

</mosaic_0001>

<bundles_post_ra>
// kernel: unflatten.1
= control target key start
LH: loop header
LB: loop body
LE: loop exit
PB: predicated region body
PF: predicated region fallthrough
CT: control target
= control target key end

     0   :  { %s38_s0 = inlined_call_operand.vmem [shape: f32[2,1024], index: 0, kind: input, shape index: {}, may-alias: {0,1}]   ;;  %s39_s1 = inlined_call_operand.vmem [shape: f32[2,1024], index: 1, kind: output, shape index: {}, may-alias: {0,1}]  }
   0x1   :  { %v8_v0 = vld [vmem:[%s38_s0] sm:$0xff]  ;;  %v9_v1 = vld [vmem:[%s38_s0 + $0x8] sm:$0xff] }
   0x2   :  { %10 = vst [vmem:[%s39_s1] sm:$0xff] %v8_v0  ;;  %11 = vst [vmem:[%s39_s1 + $0x8] sm:$0xff] %v9_v1 }

</bundles_post_ra>
